<compile_context>
chip_gen: v7x
topology: tpu7x:2x2x1
jax: 0.10.0
libtpu: 0.0.40
codegen_flags: <defaults>
</compile_context>

<pallas_src>
import functools

import jax
import jax.numpy as jnp
import numpy as np
from jax.experimental import pallas as pl
from jax.experimental.pallas import tpu as pltpu


# ---------------------------------------------------------------------------
# Fused kernel, argmax variant (action is None)
# ---------------------------------------------------------------------------
def _c51_argmax_kernel(obs_ref, w1_ref, b1_ref, w2_ref, b2_ref, w3_ref, b3_ref,
                       atoms_ref, act_ref, pmf_ref, *, action_dim, n_pad):
    x = obs_ref[...]                                               # (TB, obs_dim)
    # For large batches on v6e/v7x, casting x / w to bf16 here (keeping the f32
    # accumulate via preferred_element_type) doubles MXU throughput.
    h1 = jnp.dot(x, w1_ref[...], preferred_element_type=jnp.float32) + b1_ref[...]
    h1 = jnp.maximum(h1, 0.0)
    h2 = jnp.dot(h1, w2_ref[...], preferred_element_type=jnp.float32) + b2_ref[...]
    h2 = jnp.maximum(h2, 0.0)
    logits = jnp.dot(h2, w3_ref[...], preferred_element_type=jnp.float32) + b3_ref[...]
    # logits: (TB, action_dim * n_pad); padded columns are exactly -1e30.

    atoms = atoms_ref[...]                                         # (1, n_pad), pads = 0

    best_q = None
    best_a = None
    best_pmf = None
    for a in range(action_dim):
        seg = logits[:, a * n_pad:(a + 1) * n_pad]                 # (TB, n_pad) lane-dense
        m = jnp.max(seg, axis=1, keepdims=True)
        e = jnp.exp(seg - m)                                       # padded cols -> 0
        den = jnp.sum(e, axis=1, keepdims=True)
        pmf_a = e * pl.reciprocal(den, approx=True)                # EUP reciprocal
        q_a = jnp.sum(e * atoms, axis=1, keepdims=True) / den      # exact tiny divide
        if a == 0:
            best_q = q_a
            best_a = jnp.zeros_like(q_a, dtype=jnp.int32)
            best_pmf = pmf_a
        else:
            better = q_a > best_q                                  # strict > == first-max
            best_q = jnp.where(better, q_a, best_q)
            best_a = jnp.where(better, a, best_a)
            best_pmf = jnp.where(better, pmf_a, best_pmf)

    act_ref[...] = best_a                                          # (TB, 1) int32
    pmf_ref[...] = best_pmf                                        # (TB, n_pad) f32


# ---------------------------------------------------------------------------
# Fused kernel, provided-action variant (no argmax / q-values at all)
# ---------------------------------------------------------------------------
def _c51_action_kernel(obs_ref, w1_ref, b1_ref, w2_ref, b2_ref, w3_ref, b3_ref,
                       action_ref, pmf_ref, *, action_dim, n_pad):
    x = obs_ref[...]
    h1 = jnp.maximum(
        jnp.dot(x, w1_ref[...], preferred_element_type=jnp.float32) + b1_ref[...], 0.0)
    h2 = jnp.maximum(
        jnp.dot(h1, w2_ref[...], preferred_element_type=jnp.float32) + b2_ref[...], 0.0)
    logits = jnp.dot(h2, w3_ref[...], preferred_element_type=jnp.float32) + b3_ref[...]

    act = action_ref[...]                                          # (TB, 1) int32
    # One-hot select the chosen action's 128-wide segment, then softmax only it.
    sel_logits = jnp.zeros((logits.shape[0], n_pad), jnp.float32)
    for a in range(action_dim):
        sel = (act == a).astype(jnp.float32)                       # (TB, 1)
        sel_logits = sel_logits + sel * logits[:, a * n_pad:(a + 1) * n_pad]

    m = jnp.max(sel_logits, axis=1, keepdims=True)
    e = jnp.exp(sel_logits - m)                                    # padded cols -> 0
    den = jnp.sum(e, axis=1, keepdims=True)
    pmf_ref[...] = e * pl.reciprocal(den, approx=True)


# ---------------------------------------------------------------------------
# Wrapper
# ---------------------------------------------------------------------------
@functools.partial(jax.jit, static_argnames=("action_dim", "num_atoms", "block_b"))
def c51_forward(obs, params, atoms, action_dim, num_atoms, action=None, block_b=None):
    """Pallas implementation of C51Network.forward.

    Returns (action: (B,) int32, pmfs_selected: (B, num_atoms) float32).
    """
    w1, b1, w2, b2, w3, b3 = params
    B, obs_dim = obs.shape
    hidden = w1.shape[1]

    n_pad = pl.cdiv(num_atoms, 128) * 128          # 101 -> 128 (lane-dense)
    pad = n_pad - num_atoms
    out_pad = action_dim * n_pad

    # Lane-dense padding of the head: pad w3 columns with 0, pad b3 with -1e30
    # so padded logits softmax to exactly 0 and never pollute q-values.
    w3p = jnp.pad(w3.reshape(hidden, action_dim, num_atoms),
                  ((0, 0), (0, 0), (0, pad))).reshape(hidden, out_pad)
    b3p = jnp.pad(b3.reshape(1, action_dim, num_atoms),
                  ((0, 0), (0, 0), (0, pad)),
                  constant_values=-1e30).reshape(1, out_pad)

    # Batch tiling: whole batch in one block when small; 512-row tiles otherwise
    # (512 rows x 512 f32 out, double-buffered, also fits v7x's smaller VMEM).
    if block_b is None:
        block_b = 512 if (B > 512 and B % 512 == 0) else B
    grid = (B // block_b,)

    def row_spec(shape):
        return pl.BlockSpec(shape, lambda i: (i, 0))

    def resident_spec(shape):
        return pl.BlockSpec(shape, lambda i: (0, 0))

    weight_specs = [
        resident_spec((obs_dim, hidden)), resident_spec((1, hidden)),
        resident_spec((hidden, hidden)), resident_spec((1, hidden)),
        resident_spec((hidden, out_pad)), resident_spec((1, out_pad)),
    ]
    cparams = pltpu.CompilerParams(dimension_semantics=("parallel",))

    if action is None:
        atoms_p = jnp.pad(atoms.reshape(1, num_atoms), ((0, 0), (0, pad)))
        kernel = functools.partial(_c51_argmax_kernel,
                                   action_dim=action_dim, n_pad=n_pad)
        act_out, pmf_pad = pl.pallas_call(
            kernel,
            grid=grid,
            out_shape=(jax.ShapeDtypeStruct((B, 1), jnp.int32),
                       jax.ShapeDtypeStruct((B, n_pad), jnp.float32)),
            in_specs=[row_spec((block_b, obs_dim))] + weight_specs
                     + [resident_spec((1, n_pad))],
            out_specs=(row_spec((block_b, 1)), row_spec((block_b, n_pad))),
            compiler_params=cparams,
        )(obs, w1, b1, w2, b2, w3p, b3p, atoms_p)
        return act_out[:, 0], pmf_pad[:, :num_atoms]

    # provided-action path (trace-time specialization, no flag / argmax / q)
    action_i32 = action.astype(jnp.int32).reshape(B, 1)
    kernel = functools.partial(_c51_action_kernel,
                               action_dim=action_dim, n_pad=n_pad)
    pmf_pad = pl.pallas_call(
        kernel,
        grid=grid,
        out_shape=jax.ShapeDtypeStruct((B, n_pad), jnp.float32),
        in_specs=[row_spec((block_b, obs_dim))] + weight_specs
                 + [row_spec((block_b, 1))],
        out_specs=row_spec((block_b, n_pad)),
        compiler_params=cparams,
    )(obs, w1, b1, w2, b2, w3p, b3p, action_i32)
    return action_i32[:, 0], pmf_pad[:, :num_atoms]


# ---------------------------------------------------------------------------
# Pure-JAX reference (for correctness checking)
# ---------------------------------------------------------------------------
def c51_forward_ref(obs, params, atoms, action_dim, num_atoms, action=None):
    w1, b1, w2, b2, w3, b3 = params
    h = jax.nn.relu(obs @ w1 + b1)
    h = jax.nn.relu(h @ w2 + b2)
    logits = (h @ w3 + b3).reshape(obs.shape[0], action_dim, num_atoms)
    pmfs = jax.nn.softmax(logits, axis=2)
    q = jnp.sum(pmfs * atoms, axis=2)
    if action is None:
        action = jnp.argmax(q, axis=1)
    return action.astype(jnp.int32), pmfs[jnp.arange(obs.shape[0]), action]


# ---------------------------------------------------------------------------
if __name__ == "__main__":
    # small shapes consistent with the module's forward
    B, obs_dim, hidden_dim, action_dim, num_atoms = 8, 16, 32, 4, 101
    v_min, v_max = -100.0, 100.0

    key = jax.random.PRNGKey(0)
    k_obs, k1, k2, k3, k4, k5, k6 = jax.random.split(key, 7)

    obs = jax.random.normal(k_obs, (B, obs_dim), dtype=jnp.float32)

    # deterministic synthetic parameters (weights stored as (in, out))
    def init_w(k, fan_in, fan_out):
        bound = 1.0 / np.sqrt(fan_in)
        return jax.random.uniform(k, (fan_in, fan_out), jnp.float32, -bound, bound)

    params = (
        init_w(k1, obs_dim, hidden_dim),
        jax.random.uniform(k2, (1, hidden_dim), jnp.float32, -0.1, 0.1),
        init_w(k3, hidden_dim, hidden_dim),
        jax.random.uniform(k4, (1, hidden_dim), jnp.float32, -0.1, 0.1),
        init_w(k5, hidden_dim, action_dim * num_atoms),
        jax.random.uniform(k6, (1, action_dim * num_atoms), jnp.float32, -0.1, 0.1),
    )
    atoms = jnp.linspace(v_min, v_max, num_atoms, dtype=jnp.float32)

    # Tolerances: pmf uses the EUP approximate reciprocal (pl.reciprocal,
    # approx=True), so allow a slightly looser relative tolerance.
    RTOL, ATOL = 5e-3, 1e-5

    # action=None path (argmax inside the fused kernel)
    act, pmf_sel = c51_forward(obs, params, atoms, action_dim, num_atoms)
    jax.block_until_ready((act, pmf_sel))

    act_ref, pmf_ref = c51_forward_ref(obs, params, atoms, action_dim, num_atoms)
    assert np.array_equal(np.asarray(act), np.asarray(act_ref)), "action mismatch"
    assert np.allclose(np.asarray(pmf_sel), np.asarray(pmf_ref), rtol=RTOL, atol=ATOL), \
        "pmf mismatch"

    # provided-action path (specialized kernel: no argmax / q-values)
    given = jnp.arange(B, dtype=jnp.int32) % action_dim
    act2, pmf_sel2 = c51_forward(obs, params, atoms, action_dim, num_atoms, action=given)
    jax.block_until_ready((act2, pmf_sel2))
    act2_ref, pmf2_ref = c51_forward_ref(obs, params, atoms, action_dim, num_atoms,
                                         action=given)
    assert np.array_equal(np.asarray(act2), np.asarray(act2_ref)), "action mismatch (given)"
    assert np.allclose(np.asarray(pmf_sel2), np.asarray(pmf2_ref), rtol=RTOL, atol=ATOL), \
        "pmf mismatch (given)"

    print("KERNEL_OK")
</pallas_src>

<mosaic_0001>
module attributes {stable_mosaic.version = 11 : i64} {
  func.func @_c51_argmax_kernel(%arg0: i32, %arg1: memref<8x16xf32, #tpu.memory_space<vmem>>, %arg2: memref<16x32xf32, #tpu.memory_space<vmem>>, %arg3: memref<1x32xf32, #tpu.memory_space<vmem>>, %arg4: memref<32x32xf32, #tpu.memory_space<vmem>>, %arg5: memref<1x32xf32, #tpu.memory_space<vmem>>, %arg6: memref<32x512xf32, #tpu.memory_space<vmem>>, %arg7: memref<1x512xf32, #tpu.memory_space<vmem>>, %arg8: memref<1x128xf32, #tpu.memory_space<vmem>>, %arg9: memref<8x1xi32, #tpu.memory_space<vmem>>, %arg10: memref<8x128xf32, #tpu.memory_space<vmem>>) attributes {dimension_semantics = [#tpu.dimension_semantics<parallel>], iteration_bounds = array<i64: 1>, scalar_prefetch = 0 : i64, scratch_operands = 0 : i64, tpu.core_type = #tpu.core_type<tc>, window_params = [{transform_indices = @transform_0, window_bounds = array<i64: 8, 16>}, {pipeline_mode = #tpu.pipeline_mode<synchronous>, transform_indices = @transform_1, window_bounds = array<i64: 16, 32>}, {pipeline_mode = #tpu.pipeline_mode<synchronous>, transform_indices = @transform_2, window_bounds = array<i64: 1, 32>}, {pipeline_mode = #tpu.pipeline_mode<synchronous>, transform_indices = @transform_3, window_bounds = array<i64: 32, 32>}, {pipeline_mode = #tpu.pipeline_mode<synchronous>, transform_indices = @transform_4, window_bounds = array<i64: 1, 32>}, {pipeline_mode = #tpu.pipeline_mode<synchronous>, transform_indices = @transform_5, window_bounds = array<i64: 32, 512>}, {pipeline_mode = #tpu.pipeline_mode<synchronous>, transform_indices = @transform_6, window_bounds = array<i64: 1, 512>}, {pipeline_mode = #tpu.pipeline_mode<synchronous>, transform_indices = @transform_7, window_bounds = array<i64: 1, 128>}, {transform_indices = @transform_8, window_bounds = array<i64: 8, 1>}, {transform_indices = @transform_9, window_bounds = array<i64: 8, 128>}]} {
    %c0 = arith.constant 0 : index
    %c0_0 = arith.constant 0 : index
    %0 = vector.load %arg1[%c0, %c0_0] : memref<8x16xf32, #tpu.memory_space<vmem>>, vector<8x16xf32>
    %c0_1 = arith.constant 0 : index
    %c0_2 = arith.constant 0 : index
    %1 = vector.load %arg2[%c0_1, %c0_2] : memref<16x32xf32, #tpu.memory_space<vmem>>, vector<16x32xf32>
    %cst = arith.constant dense<0.000000e+00> : vector<8x32xf32>
    %2 = tpu.matmul %0, %1, %cst {dimension_numbers = #tpu.dot_dimension_numbers<[1], [0], [0], [1], [0, 0, 1, 1], [], []>} : vector<8x16xf32>, vector<16x32xf32>, vector<8x32xf32> -> vector<8x32xf32>
    %c0_3 = arith.constant 0 : index
    %c0_4 = arith.constant 0 : index
    %3 = vector.load %arg3[%c0_3, %c0_4] : memref<1x32xf32, #tpu.memory_space<vmem>>, vector<1x32xf32>
    %4 = vector.broadcast %3 : vector<1x32xf32> to vector<8x32xf32>
    %5 = arith.addf %2, %4 : vector<8x32xf32>
    %cst_5 = arith.constant 0.000000e+00 : f32
    %6 = vector.broadcast %cst_5 : f32 to vector<8x32xf32>
    %7 = arith.maximumf %5, %6 : vector<8x32xf32>
    %c0_6 = arith.constant 0 : index
    %c0_7 = arith.constant 0 : index
    %8 = vector.load %arg4[%c0_6, %c0_7] : memref<32x32xf32, #tpu.memory_space<vmem>>, vector<32x32xf32>
    %cst_8 = arith.constant dense<0.000000e+00> : vector<8x32xf32>
    %9 = tpu.matmul %7, %8, %cst_8 {dimension_numbers = #tpu.dot_dimension_numbers<[1], [0], [0], [1], [0, 0, 1, 1], [], []>} : vector<8x32xf32>, vector<32x32xf32>, vector<8x32xf32> -> vector<8x32xf32>
    %c0_9 = arith.constant 0 : index
    %c0_10 = arith.constant 0 : index
    %10 = vector.load %arg5[%c0_9, %c0_10] : memref<1x32xf32, #tpu.memory_space<vmem>>, vector<1x32xf32>
    %11 = vector.broadcast %10 : vector<1x32xf32> to vector<8x32xf32>
    %12 = arith.addf %9, %11 : vector<8x32xf32>
    %cst_11 = arith.constant 0.000000e+00 : f32
    %13 = vector.broadcast %cst_11 : f32 to vector<8x32xf32>
    %14 = arith.maximumf %12, %13 : vector<8x32xf32>
    %c0_12 = arith.constant 0 : index
    %c0_13 = arith.constant 0 : index
    %15 = vector.load %arg6[%c0_12, %c0_13] : memref<32x512xf32, #tpu.memory_space<vmem>>, vector<32x512xf32>
    %cst_14 = arith.constant dense<0.000000e+00> : vector<8x512xf32>
    %16 = tpu.matmul %14, %15, %cst_14 {dimension_numbers = #tpu.dot_dimension_numbers<[1], [0], [0], [1], [0, 0, 1, 1], [], []>} : vector<8x32xf32>, vector<32x512xf32>, vector<8x512xf32> -> vector<8x512xf32>
    %c0_15 = arith.constant 0 : index
    %c0_16 = arith.constant 0 : index
    %17 = vector.load %arg7[%c0_15, %c0_16] : memref<1x512xf32, #tpu.memory_space<vmem>>, vector<1x512xf32>
    %18 = vector.broadcast %17 : vector<1x512xf32> to vector<8x512xf32>
    %19 = arith.addf %16, %18 : vector<8x512xf32>
    %c0_17 = arith.constant 0 : index
    %c0_18 = arith.constant 0 : index
    %20 = vector.load %arg8[%c0_17, %c0_18] : memref<1x128xf32, #tpu.memory_space<vmem>>, vector<1x128xf32>
    %21 = vector.extract_strided_slice %19 {offsets = [0, 0], sizes = [8, 128], strides = [1, 1]} : vector<8x512xf32> to vector<8x128xf32>
    %cst_19 = arith.constant dense<0xFF800000> : vector<8xf32>
    %22 = vector.multi_reduction <maximumf>, %21, %cst_19 [1] : vector<8x128xf32> to vector<8xf32>
    %23 = vector.shape_cast %22 : vector<8xf32> to vector<8x1xf32>
    %24 = vector.broadcast %23 : vector<8x1xf32> to vector<8x128xf32>
    %25 = arith.subf %21, %24 : vector<8x128xf32>
    %26 = math.exp %25 : vector<8x128xf32>
    %cst_20 = arith.constant dense<0.000000e+00> : vector<8xf32>
    %27 = vector.multi_reduction <add>, %26, %cst_20 [1] : vector<8x128xf32> to vector<8xf32>
    %28 = vector.shape_cast %27 : vector<8xf32> to vector<8x1xf32>
    %29 = tpu.reciprocal %28 {approx = true} : vector<8x1xf32> -> vector<8x1xf32>
    %30 = vector.broadcast %29 : vector<8x1xf32> to vector<8x128xf32>
    %31 = arith.mulf %26, %30 : vector<8x128xf32>
    %32 = vector.broadcast %20 : vector<1x128xf32> to vector<8x128xf32>
    %33 = arith.mulf %26, %32 : vector<8x128xf32>
    %cst_21 = arith.constant dense<0.000000e+00> : vector<8xf32>
    %34 = vector.multi_reduction <add>, %33, %cst_21 [1] : vector<8x128xf32> to vector<8xf32>
    %35 = vector.shape_cast %34 : vector<8xf32> to vector<8x1xf32>
    %36 = arith.divf %35, %28 : vector<8x1xf32>
    %c0_i32 = arith.constant 0 : i32
    %37 = vector.broadcast %c0_i32 : i32 to vector<8x1xi32>
    %38 = vector.extract_strided_slice %19 {offsets = [0, 128], sizes = [8, 128], strides = [1, 1]} : vector<8x512xf32> to vector<8x128xf32>
    %cst_22 = arith.constant dense<0xFF800000> : vector<8xf32>
    %39 = vector.multi_reduction <maximumf>, %38, %cst_22 [1] : vector<8x128xf32> to vector<8xf32>
    %40 = vector.shape_cast %39 : vector<8xf32> to vector<8x1xf32>
    %41 = vector.broadcast %40 : vector<8x1xf32> to vector<8x128xf32>
    %42 = arith.subf %38, %41 : vector<8x128xf32>
    %43 = math.exp %42 : vector<8x128xf32>
    %cst_23 = arith.constant dense<0.000000e+00> : vector<8xf32>
    %44 = vector.multi_reduction <add>, %43, %cst_23 [1] : vector<8x128xf32> to vector<8xf32>
    %45 = vector.shape_cast %44 : vector<8xf32> to vector<8x1xf32>
    %46 = tpu.reciprocal %45 {approx = true} : vector<8x1xf32> -> vector<8x1xf32>
    %47 = vector.broadcast %46 : vector<8x1xf32> to vector<8x128xf32>
    %48 = arith.mulf %43, %47 : vector<8x128xf32>
    %49 = vector.broadcast %20 : vector<1x128xf32> to vector<8x128xf32>
    %50 = arith.mulf %43, %49 : vector<8x128xf32>
    %cst_24 = arith.constant dense<0.000000e+00> : vector<8xf32>
    %51 = vector.multi_reduction <add>, %50, %cst_24 [1] : vector<8x128xf32> to vector<8xf32>
    %52 = vector.shape_cast %51 : vector<8xf32> to vector<8x1xf32>
    %53 = arith.divf %52, %45 : vector<8x1xf32>
    %54 = arith.cmpf ogt, %53, %36 : vector<8x1xf32>
    %55 = arith.select %54, %53, %36 : vector<8x1xi1>, vector<8x1xf32>
    %c1_i32 = arith.constant 1 : i32
    %56 = vector.broadcast %c1_i32 : i32 to vector<8x1xi32>
    %57 = arith.select %54, %56, %37 : vector<8x1xi1>, vector<8x1xi32>
    %58 = vector.shape_cast %54 : vector<8x1xi1> to vector<8x1xi1>
    %59 = vector.broadcast %58 : vector<8x1xi1> to vector<8x128xi1>
    %60 = arith.select %59, %48, %31 : vector<8x128xi1>, vector<8x128xf32>
    %61 = vector.extract_strided_slice %19 {offsets = [0, 256], sizes = [8, 128], strides = [1, 1]} : vector<8x512xf32> to vector<8x128xf32>
    %cst_25 = arith.constant dense<0xFF800000> : vector<8xf32>
    %62 = vector.multi_reduction <maximumf>, %61, %cst_25 [1] : vector<8x128xf32> to vector<8xf32>
    %63 = vector.shape_cast %62 : vector<8xf32> to vector<8x1xf32>
    %64 = vector.broadcast %63 : vector<8x1xf32> to vector<8x128xf32>
    %65 = arith.subf %61, %64 : vector<8x128xf32>
    %66 = math.exp %65 : vector<8x128xf32>
    %cst_26 = arith.constant dense<0.000000e+00> : vector<8xf32>
    %67 = vector.multi_reduction <add>, %66, %cst_26 [1] : vector<8x128xf32> to vector<8xf32>
    %68 = vector.shape_cast %67 : vector<8xf32> to vector<8x1xf32>
    %69 = tpu.reciprocal %68 {approx = true} : vector<8x1xf32> -> vector<8x1xf32>
    %70 = vector.broadcast %69 : vector<8x1xf32> to vector<8x128xf32>
    %71 = arith.mulf %66, %70 : vector<8x128xf32>
    %72 = vector.broadcast %20 : vector<1x128xf32> to vector<8x128xf32>
    %73 = arith.mulf %66, %72 : vector<8x128xf32>
    %cst_27 = arith.constant dense<0.000000e+00> : vector<8xf32>
    %74 = vector.multi_reduction <add>, %73, %cst_27 [1] : vector<8x128xf32> to vector<8xf32>
    %75 = vector.shape_cast %74 : vector<8xf32> to vector<8x1xf32>
    %76 = arith.divf %75, %68 : vector<8x1xf32>
    %77 = arith.cmpf ogt, %76, %55 : vector<8x1xf32>
    %78 = arith.select %77, %76, %55 : vector<8x1xi1>, vector<8x1xf32>
    %c2_i32 = arith.constant 2 : i32
    %79 = vector.broadcast %c2_i32 : i32 to vector<8x1xi32>
    %80 = arith.select %77, %79, %57 : vector<8x1xi1>, vector<8x1xi32>
    %81 = vector.shape_cast %77 : vector<8x1xi1> to vector<8x1xi1>
    %82 = vector.broadcast %81 : vector<8x1xi1> to vector<8x128xi1>
    %83 = arith.select %82, %71, %60 : vector<8x128xi1>, vector<8x128xf32>
    %84 = vector.extract_strided_slice %19 {offsets = [0, 384], sizes = [8, 128], strides = [1, 1]} : vector<8x512xf32> to vector<8x128xf32>
    %cst_28 = arith.constant dense<0xFF800000> : vector<8xf32>
    %85 = vector.multi_reduction <maximumf>, %84, %cst_28 [1] : vector<8x128xf32> to vector<8xf32>
    %86 = vector.shape_cast %85 : vector<8xf32> to vector<8x1xf32>
    %87 = vector.broadcast %86 : vector<8x1xf32> to vector<8x128xf32>
    %88 = arith.subf %84, %87 : vector<8x128xf32>
    %89 = math.exp %88 : vector<8x128xf32>
    %cst_29 = arith.constant dense<0.000000e+00> : vector<8xf32>
    %90 = vector.multi_reduction <add>, %89, %cst_29 [1] : vector<8x128xf32> to vector<8xf32>
    %91 = vector.shape_cast %90 : vector<8xf32> to vector<8x1xf32>
    %92 = tpu.reciprocal %91 {approx = true} : vector<8x1xf32> -> vector<8x1xf32>
    %93 = vector.broadcast %92 : vector<8x1xf32> to vector<8x128xf32>
    %94 = arith.mulf %89, %93 : vector<8x128xf32>
    %95 = vector.broadcast %20 : vector<1x128xf32> to vector<8x128xf32>
    %96 = arith.mulf %89, %95 : vector<8x128xf32>
    %cst_30 = arith.constant dense<0.000000e+00> : vector<8xf32>
    %97 = vector.multi_reduction <add>, %96, %cst_30 [1] : vector<8x128xf32> to vector<8xf32>
    %98 = vector.shape_cast %97 : vector<8xf32> to vector<8x1xf32>
    %99 = arith.divf %98, %91 : vector<8x1xf32>
    %100 = arith.cmpf ogt, %99, %78 : vector<8x1xf32>
    %c3_i32 = arith.constant 3 : i32
    %101 = vector.broadcast %c3_i32 : i32 to vector<8x1xi32>
    %102 = arith.select %100, %101, %80 : vector<8x1xi1>, vector<8x1xi32>
    %103 = vector.shape_cast %100 : vector<8x1xi1> to vector<8x1xi1>
    %104 = vector.broadcast %103 : vector<8x1xi1> to vector<8x128xi1>
    %105 = arith.select %104, %94, %83 : vector<8x128xi1>, vector<8x128xf32>
    %c0_31 = arith.constant 0 : index
    %c0_32 = arith.constant 0 : index
    %106 = vector.load %arg9[%c0_31, %c0_32] : memref<8x1xi32, #tpu.memory_space<vmem>>, vector<8x1xi32>
    tpu.vector_store %arg9[%c0_31, %c0_32], %102 {strides = array<i32>} : memref<8x1xi32, #tpu.memory_space<vmem>>, vector<8x1xi32>,
    %c0_33 = arith.constant 0 : index
    %c0_34 = arith.constant 0 : index
    %107 = vector.load %arg10[%c0_33, %c0_34] : memref<8x128xf32, #tpu.memory_space<vmem>>, vector<8x128xf32>
    tpu.vector_store %arg10[%c0_33, %c0_34], %105 {strides = array<i32>} : memref<8x128xf32, #tpu.memory_space<vmem>>, vector<8x128xf32>,
    return
  }
  func.func @transform_0(%arg0: i32) -> (i32, i32) {
    %c0_i32 = arith.constant 0 : i32
    %c0_i32_0 = arith.constant 0 : i32
    return %arg0, %c0_i32 : i32, i32
  }
  func.func @transform_1(%arg0: i32) -> (i32, i32) {
    %c0_i32 = arith.constant 0 : i32
    %c0_i32_0 = arith.constant 0 : i32
    %c0_i32_1 = arith.constant 0 : i32
    return %c0_i32, %c0_i32_0 : i32, i32
  }
  func.func @transform_2(%arg0: i32) -> (i32, i32) {
    %c0_i32 = arith.constant 0 : i32
    %c0_i32_0 = arith.constant 0 : i32
    %c0_i32_1 = arith.constant 0 : i32
    return %c0_i32, %c0_i32_0 : i32, i32
  }
  func.func @transform_3(%arg0: i32) -> (i32, i32) {
    %c0_i32 = arith.constant 0 : i32
    %c0_i32_0 = arith.constant 0 : i32
    %c0_i32_1 = arith.constant 0 : i32
    return %c0_i32, %c0_i32_0 : i32, i32
  }
  func.func @transform_4(%arg0: i32) -> (i32, i32) {
    %c0_i32 = arith.constant 0 : i32
    %c0_i32_0 = arith.constant 0 : i32
    %c0_i32_1 = arith.constant 0 : i32
    return %c0_i32, %c0_i32_0 : i32, i32
  }
  func.func @transform_5(%arg0: i32) -> (i32, i32) {
    %c0_i32 = arith.constant 0 : i32
    %c0_i32_0 = arith.constant 0 : i32
    %c0_i32_1 = arith.constant 0 : i32
    return %c0_i32, %c0_i32_0 : i32, i32
  }
  func.func @transform_6(%arg0: i32) -> (i32, i32) {
    %c0_i32 = arith.constant 0 : i32
    %c0_i32_0 = arith.constant 0 : i32
    %c0_i32_1 = arith.constant 0 : i32
    return %c0_i32, %c0_i32_0 : i32, i32
  }
  func.func @transform_7(%arg0: i32) -> (i32, i32) {
    %c0_i32 = arith.constant 0 : i32
    %c0_i32_0 = arith.constant 0 : i32
    %c0_i32_1 = arith.constant 0 : i32
    return %c0_i32, %c0_i32_0 : i32, i32
  }
  func.func @transform_8(%arg0: i32) -> (i32, i32) {
    %c0_i32 = arith.constant 0 : i32
    %c0_i32_0 = arith.constant 0 : i32
    return %arg0, %c0_i32 : i32, i32
  }
  func.func @transform_9(%arg0: i32) -> (i32, i32) {
    %c0_i32 = arith.constant 0 : i32
    %c0_i32_0 = arith.constant 0 : i32
    return %arg0, %c0_i32 : i32, i32
  }
}

</mosaic_0001>

<bundles_post_ra>
// kernel: c51_forward.1
= control target key start
LH: loop header
LB: loop body
LE: loop exit
PB: predicated region body
PF: predicated region fallthrough
CT: control target
= control target key end

     0   :  { %v589_v2 = vmov 0.0|0.0   ;;  %vm590_vm0 = vmmov 0   ;;  %v591_v4 = vmov 0.0   ;;  %s743_s0 = inlined_call_operand.vmem [shape: f32[8,16], index: 0, kind: input, shape index: {}]   ;;  %s744_s1 = inlined_call_operand.vmem [shape: f32[16,32], index: 1, kind: input, shape index: {}]   ;;  %s745_s2 = inlined_call_operand.vmem [shape: f32[1,32], index: 2, kind: input, shape index: {}]   ;;  %s746_s3 = inlined_call_operand.vmem [shape: f32[32,32], index: 3, kind: input, shape index: {}]   ;;  %s747_s4 = inlined_call_operand.vmem [shape: f32[1,32], index: 4, kind: input, shape index: {}]   ;;  %s748_s5 = inlined_call_operand.vmem [shape: f32[32,512], index: 5, kind: input, shape index: {}]   ;;  %s749_s6 = inlined_call_operand.vmem [shape: f32[1,512], index: 6, kind: input, shape index: {}]   ;;  %s750_s7 = inlined_call_operand.vmem [shape: f32[1,128], index: 7, kind: input, shape index: {}]   ;;  %s751_s8 = inlined_call_operand.vmem [shape: s32[8,1], index: 8, kind: output, shape index: {0}]   ;;  %s752_s9 = inlined_call_operand.hbm [shape: f32[8,128], index: 9, kind: output, shape index: {1}]  }
   0x1   :  { %v33_v0 = vld [vmem:[%s744_s1] sm:$0xff]  ;;  %v34_v1 = vld [vmem:[%s744_s1 + $0x8] sm:$0xff]  ;;  %519 = vmatprep.subr.bf16.mxu0 %v589_v2  ;;  %505 = vmatprep.mubr.msk.f32.mxu0 %vm590_vm0, %v591_v4 }
   0x2   :  { %v520_v3 = vpack.c.bf16 %v34_v1, %v33_v0  ;;  %v117_v5 = vld [vmem:[%s746_s3] sm:$0xff]  ;;  %v118_v6 = vld [vmem:[%s746_s3 + $0x8] sm:$0xff]  ;;  %522 = vmatprep.subr.bf16.mxu1 %v589_v2  ;;  %516 = vmatprep.mubr.msk.f32.mxu1 %vm590_vm0, %v591_v4 }
   0x3   :  { %v523_v7 = vpack.c.bf16 %v118_v6, %v117_v5 }
   0x4   :  { %15 = vsyncpa [#allocation3], 0  ;;  %521 = vmatpush3.bf16.msra.mxu0 %v520_v3  ;;  %v32_v8 = vld [vmem:[%s743_s0] sm:$0xff]  ;;  %vm42_vm1 = vcmask 130048   ;;  %v119_v9 = vld [vmem:[%s746_s3 + $0x10] sm:$0xff]  ;;  %vm128_vm2 = vcmask 261120   ;;  %v221_v46 = vlaneseq }
   0x5   :  { %524 = vmatpush3.bf16.msra.mxu1 %v523_v7  ;;  %v120_v10 = vld [vmem:[%s746_s3 + $0x18] sm:$0xff]  ;;  %v204_v12 = vld [vmem:[%s748_s5 + $0x8] sm:$0xff]  ;;  %v203_v17 = vld [vmem:[%s748_s5] sm:$0xff]  ;;  %vm465_vm5 = vcmask 7168  }
   0x6   :  { %525 = vmatprep.subr.bf16.mxu1 %v589_v2  ;;  %v526_v11 = vpack.c.bf16 %v120_v10, %v119_v9  ;;  %v208_v13 = vld [vmem:[%s748_s5 + $0x28] sm:$0xff]  ;;  %v206_v14 = vld [vmem:[%s748_s5 + $0x18] sm:$0xff]  ;;  %v207_v18 = vld [vmem:[%s748_s5 + $0x20] sm:$0xff]  ;;  %v222_v47 = vshrl.u32 %v221_v46, 7 }
   0x7   :  { %506 = vmatmul.mubr.msk.f32.vlgmr.msra.gmra.mrb[0].mxu0 %vm42_vm1, %v32_v8  ;;  %v528_v15 = vpack.c.bf16 %v208_v13, %v204_v12  ;;  %v210_v16 = vld [vmem:[%s748_s5 + $0x38] sm:$0xff]  ;;  %v530_v20 = vpack.c.bf16 %v207_v18, %v203_v17  ;;  %v486_v21 = vld [vmem:[%s745_s2] ss:$0 sm:$0xff]  ;;  %v205_v22 = vld [vmem:[%s748_s5 + $0x10] sm:$0xff] }
   0x8   :  { %308 = vmatprep.mubr.f32.mxu0 %v591_v4  ;;  %v536_v19 = vpack.c.bf16 %v210_v16, %v206_v14  ;;  %v209_v23 = vld [vmem:[%s748_s5 + $0x30] sm:$0xff]  ;;  %v212_v29 = vld [vmem:[%s748_s5 + $0x48] sm:$0xff]  ;;  %v214_v31 = vld [vmem:[%s748_s5 + $0x58] sm:$0xff]  ;;  %v223_v48 = vsub.s32 0, %v222_v47  ;;  %v231_v49 = vsub.s32 2, %v222_v47  ;;  %v227_v53 = vsub.s32 1, %v222_v47 }
   0x9   :  { %527 = vmatpush3.bf16.msra.mxu1 %v526_v11  ;;  %529 = vmatprep.subr.bf16.mxu0 %v528_v15  ;;  %v538_v27 = vpack.c.bf16 %v209_v23, %v205_v22  ;;  %v216_v30 = vld [vmem:[%s748_s5 + $0x68] sm:$0xff]  ;;  %v218_v33 = vld [vmem:[%s748_s5 + $0x78] sm:$0xff]  ;;  %v211_v34 = vld [vmem:[%s748_s5 + $0x40] sm:$0xff]  ;;  %v235_v54 = vsub.s32 3, %v222_v47 }
   0xa   :  { %537 = vmatprep.subr.bf16.mxu1 %v536_v19  ;;  %531 = vmatpush1.bf16.msra.mxu0 %v530_v20  ;;  %v532_v32 = vpack.c.bf16 %v216_v30, %v212_v29  ;;  %v215_v35 = vld [vmem:[%s748_s5 + $0x60] sm:$0xff]  ;;  %v540_v36 = vpack.c.bf16 %v218_v33, %v214_v31  ;;  %v213_v38 = vld [vmem:[%s748_s5 + $0x50] sm:$0xff] }
   0xb   :  { %v534_v37 = vpack.c.bf16 %v215_v35, %v211_v34  ;;  %v217_v39 = vld [vmem:[%s748_s5 + $0x70] sm:$0xff]  ;;  %v488_v41 = vld [vmem:[%s747_s4] ss:$0 sm:$0xff] }
   0xc   :  { %533 = vmatprep.subr.bf16.mxu0 %v532_v32  ;;  %v542_v40 = vpack.c.bf16 %v217_v39, %v213_v38  ;;  %v219_v50 = vld [vmem:[%s749_s6] sm:$0xf]  ;;  %v592_v38 = vmov 0  }
   0xd   :  { %v224_v51 = vrot.slane %v219_v50, %v223_v48  ;;  %v232_v52 = vrot.slane %v219_v50, %v231_v49  ;;  %v228_v59 = vrot.slane %v219_v50, %v227_v53  ;;  %v236_v61 = vrot.slane %v219_v50, %v235_v54  ;;  %v492_v16 = vld [vmem:[%s750_s7] ss:$0 sm:$0xff]  ;;  %s593_s7 = smov [#allocation2]  }
   0xe   :  { %535 = vmatpush1.bf16.msra.mxu0 %v534_v37  ;;  %s476_s11 = sshll.u32 %s593_s7, 4  ;;  %s477_s11 = int_to_ptr.vmem [resolvable:$true] %s476_s11 }
   0xf   :  { %s565_s14 = scalar_lea.vmem %s477_s11, 128  ;;  %p570_p1 = scmp.lt.s32.totalorder %s477_s11, %s477_s11 }
  0x10   :  { %p566_p0 = scmp.ne.s32.totalorder %s477_s11, %s565_s14  ;;  %p571_p2 = scmp.lt.s32.totalorder %s565_s14, %s565_s14 }
  0x12   :  { %p572_p3 = por %p571_p2, %p570_p1 }
  0x14   :  { %p573_p4 = pnand %p572_p3, %p566_p0 }
  0xda   :  { %v112_v24 = vpop.f32.mrb[0].mxu0 }
  0xdb   :  { %v113_v25 = vadd.f32 %v486_v21, %v112_v24  ;;  %v507_v26 = vpop.f32.mrb[1].mxu0 }
  0xdd   :  { %v116_v28 = vmax.f32 %v113_v25, 0.0 }
  0xdf   :  { %517 = vmatmul.mubr.msk.f32.vlgmr.msra.gmra.mrb[0].mxu1 %vm128_vm2, %v116_v28 }
  0xe0   :  { %539 = vmatpush1.bf16.msra.mxu1 %v538_v27  ;;  %379 = vmatprep.mubr.f32.mxu1 %v591_v4 }
  0xe1   :  { %541 = vmatprep.subr.bf16.mxu1 %v540_v36 }
  0xe4   :  { %543 = vmatpush1.bf16.msra.mxu1 %v542_v40 }
 0x1b2   :  { %v198_v42 = vpop.f32.mrb[0].mxu1 }
 0x1b3   :  { %v199_v43 = vadd.f32 %v488_v41, %v198_v42  ;;  %v518_v44 = vpop.f32.mrb[1].mxu1 }
 0x1b5   :  { %v202_v45 = vmax.f32 %v199_v43, 0.0 }
 0x1b7   :  { %490 = vmatmul.mubr.msk.f32.vlgmr.msra.gmra.mrb[2].mxu0 %vm128_vm2, %v202_v45  ;;  %491 = vmatmul.mubr.msk.f32.vlgmr.msra.gmra.mrb[2].mxu1 %vm128_vm2, %v202_v45 }
 0x28a   :  { %v310_v55 = vpop.f32.mrb[2].mxu0  ;;  %v381_v56 = vpop.f32.mrb[2].mxu1 }
 0x28b   :  { %v311_v57 = vadd.f32 %v310_v55, %v224_v51  ;;  %v382_v58 = vadd.f32 %v381_v56, %v232_v52  ;;  %v312_v60 = vpop.f32.mrb[3].mxu0  ;;  %v383_v62 = vpop.f32.mrb[3].mxu1 }
 0x28c   :  { %v313_v63 = vadd.f32 %v312_v60, %v228_v59  ;;  %v384_v0 = vadd.f32 %v383_v62, %v236_v61 }
 0x28d   :  { %426 = vmax.xlane.f32.xlu1 %v382_v58  ;;  %387 = vmax.xlane.f32.xlu0 %v311_v57 }
 0x291   :  { %446 = vmax.xlane.f32.xlu1 %v384_v0  ;;  %407 = vmax.xlane.f32.xlu0 %v313_v63 }
 0x31a   :  { %v427_v1 = vpop.xlane.xlu1 %426  ;;  %v388_v2 = vpop.xlane.xlu0 %387 }
 0x31b   :  { %v428_v3 = vsub.f32 %v382_v58, %v427_v1  ;;  %v389_v4 = vsub.f32 %v311_v57, %v388_v2 }
 0x31d   :  { %v390_v5 = vmul.f32 1.442695, %v389_v4  ;;  %v429_v8 = vmul.f32 1.442695, %v428_v3 }
 0x31e   :  { %v447_v6 = vpop.xlane.xlu1 %446  ;;  %v408_v7 = vpop.xlane.xlu0 %407 }
 0x31f   :  { %v409_v9 = vsub.f32 %v313_v63, %v408_v7  ;;  %549 = vpow2.f32 %v390_v5  ;;  %v448_v10 = vsub.f32 %v384_v0, %v447_v6 }
 0x320   :  { %551 = vpow2.f32 %v429_v8 }
 0x321   :  { %v410_v11 = vmul.f32 1.442695, %v409_v9  ;;  %v449_v12 = vmul.f32 1.442695, %v448_v10 }
 0x323   :  { %553 = vpow2.f32 %v410_v11 }
 0x324   :  { %555 = vpow2.f32 %v449_v12 }
 0x329   :  { %v550_v13 = vpop.eup %549 }
 0x32a   :  { %392 = vadd.xlane.f32.xlu0 %v550_v13  ;;  %v552_v14 = vpop.eup %551  ;;  %v402_v17 = vmul.f32 %v550_v13, %v492_v16 }
 0x32b   :  { %v435_v19 = vmul.f32 %v552_v14, %v492_v16 }
 0x32d   :  { %v554_v15 = vpop.eup %553 }
 0x32e   :  { %431 = vadd.xlane.f32.xlu0 %v552_v14  ;;  %412 = vadd.xlane.f32.xlu1 %v554_v15  ;;  %v556_v18 = vpop.eup %555  ;;  %v416_v20 = vmul.f32 %v554_v15, %v492_v16 }
 0x32f   :  { %v455_v21 = vmul.f32 %v556_v18, %v492_v16 }
 0x332   :  { %403 = vadd.xlane.f32.xlu0 %v402_v17  ;;  %451 = vadd.xlane.f32.xlu1 %v556_v18 }
 0x336   :  { %436 = vadd.xlane.f32.xlu0 %v435_v19  ;;  %417 = vadd.xlane.f32.xlu1 %v416_v20 }
 0x33a   :  { %456 = vadd.xlane.f32.xlu1 %v455_v21 }
 0x3b7   :  { %v393_v22 = vpop.xlane.xlu0 %392 }
 0x3b8   :  { %557 = vrcp.f32 %v393_v22 }
 0x3bb   :  { %v413_v23 = vpop.xlane.xlu1 %412  ;;  %v432_v24 = vpop.xlane.xlu0 %431 }
 0x3bc   :  { %559 = vrcp.f32 %v413_v23 }
 0x3bd   :  { %561 = vrcp.f32 %v432_v24 }
 0x3bf   :  { %v452_v25 = vpop.xlane.xlu1 %451  ;;  %v404_v26 = vpop.xlane.xlu0 %403 }
 0x3c0   :  { %563 = vrcp.f32 %v452_v25 }
 0x3c2   :  { %v558_v27 = vpop.eup %557 }
 0x3c3   :  { %v418_v28 = vpop.xlane.xlu1 %417  ;;  %v406_v31 = vmul.f32 %v558_v27, %v404_v26  ;;  %v395_v34 = vmul.f32 %v558_v27, %v550_v13  ;;  %v437_v35 = vpop.xlane.xlu0 %436 }
 0x3c6   :  { %v560_v29 = vpop.eup %559 }
 0x3c7   :  { %v562_v30 = vpop.eup %561  ;;  %v415_v32 = vmul.f32 %v560_v29, %v554_v15  ;;  %v420_v33 = vmul.f32 %v560_v29, %v418_v28  ;;  %v457_v42 = vpop.xlane.xlu1 %456 }
 0x3c8   :  { %v439_v36 = vmul.f32 %v562_v30, %v437_v35  ;;  %v434_v43 = vmul.f32 %v562_v30, %v552_v14 }
 0x3c9   :  { %vm421_vm3 = vcmp.gt.f32.partialorder %v420_v33, %v406_v31 }
 0x3ca   :  { %v564_v37 = vpop.eup %563  ;;  %v423_v39 = vsel %vm421_vm3, 1, %v592_v38  ;;  %v425_v40 = vsel %vm421_vm3, %v415_v32, %v395_v34  ;;  %v422_v41 = vsel %vm421_vm3, %v420_v33, %v406_v31 }
 0x3cb   :  { %vm440_vm4 = vcmp.gt.f32.partialorder %v439_v36, %v422_v41  ;;  %v459_v44 = vmul.f32 %v564_v37, %v457_v42  ;;  %v454_v45 = vmul.f32 %v564_v37, %v556_v18 }
 0x3cc   :  { %v441_v46 = vsel %vm440_vm4, %v439_v36, %v422_v41  ;;  %v442_v47 = vsel %vm440_vm4, 2, %v423_v39  ;;  %v445_v48 = vsel %vm440_vm4, %v434_v43, %v425_v40 }
 0x3cd   :  { %vm460_vm6 = vcmp.gt.f32.partialorder %v459_v44, %v441_v46 }
 0x3ce   :  { %v461_v49 = vsel %vm460_vm6, 3, %v442_v47  ;;  %v464_v50 = vsel %vm460_vm6, %v454_v45, %v445_v48 }
 0x3cf   :  { %466 = vst.msk [vmem:[%s751_s8] sm:$0xff] %vm465_vm5, %v461_v49  ;;  %467 = vst [vmem:[#allocation2] sm:$0xff] %v464_v50 }
 0x3d0   :  { %576 = shalt.err (!%p573_p4)
}
 0x3d1   :  { %s577_s1 = scalar_lea.hbm %s752_s9, 128 }
 0x3d2   :  { %p578_p5 = scmp.ne.s32.totalorder %s752_s9, %s577_s1  ;;  %p581_p6 = scmp.lt.u32.totalorder %s577_s1, %s752_s9 }
 0x3d4   :  { %p583_p7 = pnand %p581_p6, %p578_p5 }
 0x3d6   :  { %586 = shalt.err (!%p583_p7)
}
 0x3d7   :  { %479 = dma.vmem_to_hbm [thread:$0]  %s477_s11, 128, %s752_s9, [#allocation3]  }
 0x3d8   :  { %587 = dma.done.wait [#allocation3], 128  }
 0x3d9   :  { %588 = vsyncadd [#allocation3], 4294967168 }
 0x3da   :  { %485 = vsyncpa [#allocation3], 1 }

</bundles_post_ra>
